<compile_context>
chip_gen: v7x
topology: tpu7x:2x2x1
jax: 0.10.0
libtpu: 0.0.40
codegen_flags: <defaults>
</compile_context>

<pallas_src>
import functools

import jax
import jax.numpy as jnp
from jax import lax
from jax.experimental import pallas as pl
from jax.experimental.pallas import tpu as pltpu


# ----------------------------------------------------------------------------
# Tiling helpers
# ----------------------------------------------------------------------------

_VMEM_LIMIT = 32 * 1024 * 1024   # explicit scoped-VMEM limit, safe on v5e/v6e/v7x


def _cparams(n_axes):
    return pltpu.CompilerParams(
        dimension_semantics=("parallel",) * n_axes,
        vmem_limit_bytes=_VMEM_LIMIT)


def _row_tiling(n, target):
    """Return (tile, n_pad): tile is a multiple of 8 and <= target.

    Prefers >= 2 grid steps (so a 'parallel' axis can be sharded across both
    TensorCores on v7x) and never returns an untiled slab: callers pad rows up
    to n_pad = ceil(n / tile) * tile instead."""
    tile = max(8, (min(target, n) // 8) * 8)
    if n >= 16 and 2 * tile > n:                 # would give a single grid step
        tile = max(8, ((-(-n // 2)) + 7) // 8 * 8)
    n_pad = -(-n // tile) * tile
    return tile, n_pad


def _largest_divisor(n, target):
    t = max(1, min(n, target))
    while n % t:
        t -= 1
    return t


def _pick_block(n, target):
    """Largest divisor of n <= target, preferring >= 2 grid steps."""
    cap = min(target, n)
    if n >= 2:
        cap = min(cap, n // 2)
    return _largest_divisor(n, max(cap, 1))


def _pad_rows(x, n_pad):
    n = x.shape[0]
    if n_pad == n:
        return x
    return jnp.pad(x, ((0, n_pad - n),) + ((0, 0),) * (x.ndim - 1))


# ----------------------------------------------------------------------------
# Pallas kernels
# ----------------------------------------------------------------------------

def _matmul_bias_kernel(x_ref, w_ref, b_ref, o_ref, *, relu):
    acc = jnp.dot(x_ref[...], w_ref[...], preferred_element_type=jnp.float32)
    acc = acc + b_ref[...]
    if relu:
        acc = jnp.maximum(acc, 0.0)
    o_ref[...] = acc.astype(o_ref.dtype)


def matmul_bias(x, w, b, *, relu=False, target_rows=2048):
    """y = x @ w + b (optionally ReLU).  x: (N, K), w: (K, M), b: (M,)."""
    N, K = x.shape
    M = w.shape[1]
    tm, n_pad = _row_tiling(N, target_rows)
    nt = n_pad // tm
    xp = _pad_rows(x, n_pad)
    out = pl.pallas_call(
        functools.partial(_matmul_bias_kernel, relu=relu),
        out_shape=jax.ShapeDtypeStruct((n_pad, M), x.dtype),
        grid=(nt,),
        in_specs=[
            pl.BlockSpec((tm, K), lambda i: (i, 0)),
            pl.BlockSpec((K, M), lambda i: (0, 0)),
            pl.BlockSpec((1, M), lambda i: (0, 0)),
        ],
        out_specs=pl.BlockSpec((tm, M), lambda i: (i, 0)),
        compiler_params=_cparams(1),
    )(xp, w, b.reshape(1, M))
    return out[:N] if n_pad != N else out


def _spectral_mul_kernel(a_ref, w_ref, o_ref, *, nb, nd):
    # a: (kk, 2B, C) rows = [ar ; ai].  w: (kk, C, 2D) cols = [wr | wi].
    # ONE batched MXU pass per mode (K = batch dim); real/imag recombination is
    # plain VPU add/sub on otherwise-idle slots (old version used 3 passes).
    res = lax.dot_general(a_ref[...], w_ref[...],
                          (((2,), (1,)), ((0,), (0,))),
                          preferred_element_type=jnp.float32)     # (kk, 2B, 2D)
    rr = res[:, :nb, :nd]     # ar @ wr
    ri = res[:, :nb, nd:]     # ar @ wi
    ir = res[:, nb:, :nd]     # ai @ wr
    ii = res[:, nb:, nd:]     # ai @ wi
    # Lane-dense (2D-wide) output: [real | imag] on the last axis.
    o_ref[...] = jnp.concatenate([rr - ii, ir + ri], axis=-1)     # (kk, B, 2D)


def spectral_mul(a_stack, w_cat, batch):
    """a_stack: (K, 2B, C) stacked real/imag modes; w_cat: (K, C, 2D) = [wr|wi].

    Returns (K, B, 2D) float32 with the last axis laid out as [real | imag]."""
    K, _, C = a_stack.shape
    D2 = w_cat.shape[2]
    kk = _pick_block(K, 128)
    nk = K // kk
    return pl.pallas_call(
        functools.partial(_spectral_mul_kernel, nb=batch, nd=D2 // 2),
        out_shape=jax.ShapeDtypeStruct((K, batch, D2), jnp.float32),
        grid=(nk,),
        in_specs=[
            pl.BlockSpec((kk, 2 * batch, C), lambda i: (i, 0, 0)),
            pl.BlockSpec((kk, C, D2), lambda i: (i, 0, 0)),
        ],
        out_specs=pl.BlockSpec((kk, batch, D2), lambda i: (i, 0, 0)),
        compiler_params=_cparams(1),
    )(a_stack, w_cat)


def _block_pre_kernel(conv_ref, x_ref, w_ref, b_ref, y_ref, s_ref, ss_ref):
    # y = conv + (x @ sc_w + sc_b); per-channel partial sum / sumsq in one pass.
    sc = jnp.dot(x_ref[...], w_ref[...], preferred_element_type=jnp.float32)
    y = conv_ref[...] + sc + b_ref[...]
    y_ref[...] = y.astype(y_ref.dtype)
    s_ref[...] = jnp.sum(y, axis=0, keepdims=True)[None]          # (1, 1, C)
    ss_ref[...] = jnp.sum(y * y, axis=0, keepdims=True)[None]     # (1, 1, C)


def _scale_shift_kernel(y_ref, sc_ref, sh_ref, o_ref, *, relu):
    out = y_ref[...] * sc_ref[...] + sh_ref[...]
    if relu:
        out = jnp.maximum(out, 0.0)
    o_ref[...] = out.astype(o_ref.dtype)


def fused_shortcut_bn(conv_flat, x_flat, sc_w, sc_b, gamma, beta, *,
                      relu, eps=1e-5, target_rows=2048):
    """BatchNorm2d(train)( conv + Conv1d_1x1(x) ) with optional ReLU.

    conv_flat / x_flat: (N, C) pixel-major slabs (N = B*H*W)."""
    N, C = x_flat.shape
    tm, n_pad = _row_tiling(N, target_rows)
    nt = n_pad // tm
    pad = n_pad - N
    conv_p = _pad_rows(conv_flat, n_pad)
    x_p = _pad_rows(x_flat, n_pad)

    y, s, ss = pl.pallas_call(
        _block_pre_kernel,
        out_shape=(
            jax.ShapeDtypeStruct((n_pad, C), jnp.float32),
            jax.ShapeDtypeStruct((nt, 1, C), jnp.float32),
            jax.ShapeDtypeStruct((nt, 1, C), jnp.float32),
        ),
        grid=(nt,),
        in_specs=[
            pl.BlockSpec((tm, C), lambda i: (i, 0)),
            pl.BlockSpec((tm, C), lambda i: (i, 0)),
            pl.BlockSpec((C, C), lambda i: (0, 0)),
            pl.BlockSpec((1, C), lambda i: (0, 0)),
        ],
        out_specs=(
            pl.BlockSpec((tm, C), lambda i: (i, 0)),
            pl.BlockSpec((1, 1, C), lambda i: (i, 0, 0)),
            pl.BlockSpec((1, 1, C), lambda i: (i, 0, 0)),
        ),
        compiler_params=_cparams(1),
    )(conv_p, x_p, sc_w, sc_b.reshape(1, C))

    # Finalize batch statistics (tiny C-length vectors) and fold into one FMA.
    tot_s = jnp.sum(s, axis=0)[0]
    tot_ss = jnp.sum(ss, axis=0)[0]
    if pad:
        # Padded rows have conv = 0 and x = 0, so y = sc_b exactly there: remove
        # their (analytically known) contribution so stats use the true N.
        tot_s = tot_s - pad * sc_b
        tot_ss = tot_ss - pad * (sc_b * sc_b)
    mean = tot_s / N
    # NOTE: E[y^2]-E[y]^2 in f32 is fine for BN-scale activations; switch to a
    # shifted / Welford-style merge if activations can grow |mean| >> std.
    var = tot_ss / N - mean * mean
    scale = gamma * lax.rsqrt(var + eps)
    shift = beta - mean * scale

    kern = functools.partial(_scale_shift_kernel, relu=relu)
    lane_ok = (128 % C == 0) and ((tm * C) % (128 * 8) == 0)
    if lane_ok:
        # 128-lane-dense pass: the (n_pad, C) slab is contiguous, so the reshape
        # is a free view; scale/shift are tiled across the lane so every
        # load/store uses all 128 lanes (unmasked vst).
        rep = 128 // C
        rows = n_pad * C // 128
        tr = tm * C // 128
        out = pl.pallas_call(
            kern,
            out_shape=jax.ShapeDtypeStruct((rows, 128), jnp.float32),
            grid=(nt,),
            in_specs=[
                pl.BlockSpec((tr, 128), lambda i: (i, 0)),
                pl.BlockSpec((1, 128), lambda i: (0, 0)),
                pl.BlockSpec((1, 128), lambda i: (0, 0)),
            ],
            out_specs=pl.BlockSpec((tr, 128), lambda i: (i, 0)),
            compiler_params=_cparams(1),
        )(y.reshape(rows, 128),
          jnp.tile(scale, rep).reshape(1, 128),
          jnp.tile(shift, rep).reshape(1, 128))
        out = out.reshape(n_pad, C)
    else:
        out = pl.pallas_call(
            kern,
            out_shape=jax.ShapeDtypeStruct((n_pad, C), jnp.float32),
            grid=(nt,),
            in_specs=[
                pl.BlockSpec((tm, C), lambda i: (i, 0)),
                pl.BlockSpec((1, C), lambda i: (0, 0)),
                pl.BlockSpec((1, C), lambda i: (0, 0)),
            ],
            out_specs=pl.BlockSpec((tm, C), lambda i: (i, 0)),
            compiler_params=_cparams(1),
        )(y, scale.reshape(1, C), shift.reshape(1, C))
    return out[:N] if pad else out


def _head_kernel(x_ref, w1_ref, b1_ref, w2_ref, b2_ref, o_ref):
    # fc1 (+ReLU) and fc2 fused; the (tm, 128) intermediate never leaves VMEM.
    h = jnp.dot(x_ref[...], w1_ref[...], preferred_element_type=jnp.float32)
    h = jnp.maximum(h + b1_ref[...], 0.0)
    # fc2 as (1,128) x (tm,128)^T -> (1, tm): lane-dense output row.
    out = lax.dot_general(w2_ref[...], h, (((1,), (1,)), ((), ())),
                          preferred_element_type=jnp.float32)
    o_ref[...] = (out + b2_ref[...])[None].astype(o_ref.dtype)


def head(x, w1, b1, w2, b2, *, target_rows=512):
    """relu(x @ w1 + b1) @ w2 + b2, fused.  x: (N, K), w1: (K, 128), w2: (128, 1).

    target_rows kept modest: the (tm, 128) f32 fc1 intermediate lives in VMEM
    and v5e has only one vector-store slot."""
    N, K = x.shape
    M = w1.shape[1]
    tm, n_pad = _row_tiling(N, target_rows)
    nt = n_pad // tm
    xp = _pad_rows(x, n_pad)
    out = pl.pallas_call(
        _head_kernel,
        out_shape=jax.ShapeDtypeStruct((nt, 1, tm), jnp.float32),
        grid=(nt,),
        in_specs=[
            pl.BlockSpec((tm, K), lambda i: (i, 0)),
            pl.BlockSpec((K, M), lambda i: (0, 0)),
            pl.BlockSpec((1, M), lambda i: (0, 0)),
            pl.BlockSpec((1, M), lambda i: (0, 0)),
            pl.BlockSpec((1, 1), lambda i: (0, 0)),
        ],
        out_specs=pl.BlockSpec((1, 1, tm), lambda i: (i, 0, 0)),
        compiler_params=_cparams(1),
    )(xp, w1, b1.reshape(1, M), w2.reshape(1, M), b2.reshape(1, 1))
    return out.reshape(n_pad, 1)[:N]


# ----------------------------------------------------------------------------
# Model (glue in plain JAX, hot paths in the kernels above)
# ----------------------------------------------------------------------------

def _pack_spectral(w1_r, w1_i, w2_r, w2_i):
    """(C, C, m, m) params -> (2*m*m, C, 2C) packed RHS [wr | wi], both regions.

    Called once at init (hoisted out of the forward pass)."""
    def p(w):
        ci, co, mm, _ = w.shape
        return jnp.transpose(w, (2, 3, 1, 0)).reshape(mm * mm, co, ci)
    wr = jnp.concatenate([p(w1_r), p(w2_r)], axis=0)
    wi = jnp.concatenate([p(w1_i), p(w2_i)], axis=0)
    return jnp.concatenate([wr, wi], axis=-1)


def spectral_conv2d(x, spec_w, n_modes):
    """x: (B, H, W, C) float32 NHWC.  spec_w: (2*m*m, C, 2D) packed [wr | wi]."""
    B, H, W, C = x.shape
    m = n_modes
    D = spec_w.shape[2] // 2
    Wf = W // 2 + 1

    # TODO(synk): FFT stays in XLA (no Pallas FFT primitive).
    x_ft = jnp.fft.rfft2(x, axes=(1, 2), norm="ortho")            # (B, H, Wf, C)

    lo = x_ft[:, :m, :m, :]                                       # (B, m, m, C)
    hi = x_ft[:, H - m:, :m, :]                                   # (B, m, m, C)
    am = jnp.concatenate([lo, hi], axis=1).reshape(B, 2 * m * m, C)
    a_stack = jnp.concatenate([jnp.real(am), jnp.imag(am)], axis=0)   # (2B, K, C)
    a_stack = jnp.transpose(a_stack, (1, 0, 2)).astype(jnp.float32)   # (K, 2B, C)

    o = spectral_mul(a_stack, spec_w, B)                          # (K, B, 2D)
    o = jnp.transpose(o, (1, 0, 2)).reshape(B, 2, m, m, 2 * D)
    o_c = lax.complex(o[..., :D], o[..., D:])                     # (B, 2, m, m, D)

    # Build out_ft with one concat + one pad (no zeros + two scatter passes).
    mid = jnp.zeros((B, H - 2 * m, m, D), jnp.complex64)
    cols = jnp.concatenate([o_c[:, 0], mid, o_c[:, 1]], axis=1)   # (B, H, m, D)
    out_ft = jnp.pad(cols, ((0, 0), (0, 0), (0, Wf - m), (0, 0)))
    return jnp.fft.irfft2(out_ft, s=(H, W), axes=(1, 2),
                          norm="ortho").astype(jnp.float32)


def fourier_block(x, blk, n_modes):
    """NeuralFourierBlock.forward, channels-last.  x: (B, H, W, C)."""
    B, H, W, C = x.shape
    conv = spectral_conv2d(x, blk["spec_w"], n_modes)             # (B, H, W, C)
    N = B * H * W
    out = fused_shortcut_bn(conv.reshape(N, C), x.reshape(N, C),
                            blk["sc_w"], blk["sc_b"],
                            blk["bn_g"], blk["bn_b"],
                            relu=blk["activation"])
    return out.reshape(B, H, W, C)


def fourier_net(x, params, n_modes, width):
    """FourierNet.forward.  x: (B, X, Y, 12) -> (B, X, Y, 1)."""
    B, X, Y, Cin = x.shape
    N = B * X * Y
    h = matmul_bias(x.reshape(N, Cin), params["fc0_w"], params["fc0_b"])
    h = h.reshape(B, X, Y, width)                                 # stays NHWC
    for blk in params["blocks"]:
        h = fourier_block(h, blk, n_modes)
    out = head(h.reshape(N, width), params["fc1_w"], params["fc1_b"],
               params["fc2_w"], params["fc2_b"])
    return out.reshape(B, X, Y, 1)


# ----------------------------------------------------------------------------
# Deterministic parameter init (shapes match the PyTorch __init__)
# ----------------------------------------------------------------------------

def init_params(key, n_layers, n_modes, width):
    keys = iter(jax.random.split(key, 64))

    def unif(shape, lo, hi):
        return jax.random.uniform(next(keys), shape, jnp.float32, lo, hi)

    params = {
        # Linear weights stored pre-transposed as (in, out) for x @ w.
        "fc0_w": unif((12, width), -0.1, 0.1),
        "fc0_b": unif((width,), -0.1, 0.1),
        "fc1_w": unif((width, 128), -0.1, 0.1),
        "fc1_b": unif((128,), -0.1, 0.1),
        "fc2_w": unif((128, 1), -0.1, 0.1),
        "fc2_b": unif((1,), -0.1, 0.1),
    }
    scale = 1.0 / (width * width)
    blocks = []
    for i in range(n_layers):
        blk = {
            # weights{1,2}: (in_ch, out_ch, m, m) real and imag parts (torch last dim 2).
            "w1_r": scale * unif((width, width, n_modes, n_modes), 0.0, 1.0),
            "w1_i": scale * unif((width, width, n_modes, n_modes), 0.0, 1.0),
            "w2_r": scale * unif((width, width, n_modes, n_modes), 0.0, 1.0),
            "w2_i": scale * unif((width, width, n_modes, n_modes), 0.0, 1.0),
            # Conv1d(width, width, 1) weight squeezed to (in, out) for x @ w.
            "sc_w": unif((width, width), -0.1, 0.1),
            "sc_b": unif((width,), -0.1, 0.1),
            "bn_g": jnp.ones((width,), jnp.float32),
            "bn_b": jnp.zeros((width,), jnp.float32),
            "activation": i < n_layers - 1,   # last block has activation=False
        }
        # Packed spectral RHS built once here (not per forward pass).
        blk["spec_w"] = _pack_spectral(blk["w1_r"], blk["w1_i"],
                                       blk["w2_r"], blk["w2_i"])
        blocks.append(blk)
    params["blocks"] = blocks
    return params


# ----------------------------------------------------------------------------
# Pure-JAX reference (same math, no Pallas) for a sanity check
# ----------------------------------------------------------------------------

def reference_forward(x, params, n_modes, width):
    B, X, Y, _ = x.shape
    h = x @ params["fc0_w"] + params["fc0_b"]
    h = jnp.transpose(h, (0, 3, 1, 2))
    for blk in params["blocks"]:
        Bn, C, H, W = h.shape
        m = n_modes
        x_ft = jnp.fft.rfft2(h, norm="ortho")
        w1 = blk["w1_r"] + 1j * blk["w1_i"]
        w2 = blk["w2_r"] + 1j * blk["w2_i"]
        out_ft = jnp.zeros((Bn, C, H, W // 2 + 1), jnp.complex64)
        out_ft = out_ft.at[:, :, :m, :m].set(
            jnp.einsum("bctq,dctq->bdtq", x_ft[:, :, :m, :m], w1))
        out_ft = out_ft.at[:, :, H - m:, :m].set(
            jnp.einsum("bctq,dctq->bdtq", x_ft[:, :, -m:, :m], w2))
        conv = jnp.fft.irfft2(out_ft, s=(H, W), norm="ortho")
        sc = jnp.einsum("bchw,cd->bdhw", h, blk["sc_w"]) + blk["sc_b"][None, :, None, None]
        y = conv + sc
        mean = jnp.mean(y, axis=(0, 2, 3), keepdims=True)
        var = jnp.mean((y - mean) ** 2, axis=(0, 2, 3), keepdims=True)
        y = (y - mean) / jnp.sqrt(var + 1e-5)
        y = y * blk["bn_g"][None, :, None, None] + blk["bn_b"][None, :, None, None]
        if blk["activation"]:
            y = jnp.maximum(y, 0.0)
        h = y
    h = jnp.transpose(h, (0, 2, 3, 1))
    h = jnp.maximum(h @ params["fc1_w"] + params["fc1_b"], 0.0)
    h = h @ params["fc2_w"] + params["fc2_b"]
    return h


# ----------------------------------------------------------------------------
# Main
# ----------------------------------------------------------------------------

if __name__ == "__main__":
    n_layers, n_modes, width = 2, 4, 16
    B, X, Y = 2, 16, 16

    key = jax.random.PRNGKey(0)
    k_params, k_x = jax.random.split(key)
    params = init_params(k_params, n_layers, n_modes, width)
    x = jax.random.normal(k_x, (B, X, Y, 12), jnp.float32)

    out = fourier_net(x, params, n_modes, width)
    out = jax.block_until_ready(out)
    assert out.shape == (B, X, Y, 1), out.shape

    ref = jax.block_until_ready(reference_forward(x, params, n_modes, width))
    assert bool(jnp.allclose(out, ref, rtol=1e-2, atol=1e-2)), (
        float(jnp.max(jnp.abs(out - ref))))

    print("KERNEL_OK")
</pallas_src>

<mosaic_0001>
module attributes {stable_mosaic.version = 11 : i64} {
  func.func @_matmul_bias_kernel(%arg0: i32, %arg1: memref<256x12xf32, #tpu.memory_space<vmem>>, %arg2: memref<12x16xf32, #tpu.memory_space<vmem>>, %arg3: memref<1x16xf32, #tpu.memory_space<vmem>>, %arg4: memref<256x16xf32, #tpu.memory_space<vmem>>) attributes {dimension_semantics = [#tpu.dimension_semantics<parallel>], iteration_bounds = array<i64: 2>, scalar_prefetch = 0 : i64, scratch_operands = 0 : i64, tpu.core_type = #tpu.core_type<tc>, window_params = [{transform_indices = @transform_0, window_bounds = array<i64: 256, 12>}, {pipeline_mode = #tpu.pipeline_mode<synchronous>, transform_indices = @transform_1, window_bounds = array<i64: 12, 16>}, {pipeline_mode = #tpu.pipeline_mode<synchronous>, transform_indices = @transform_2, window_bounds = array<i64: 1, 16>}, {transform_indices = @transform_3, window_bounds = array<i64: 256, 16>}]} {
    %c0 = arith.constant 0 : index
    %c0_0 = arith.constant 0 : index
    %0 = vector.load %arg1[%c0, %c0_0] : memref<256x12xf32, #tpu.memory_space<vmem>>, vector<256x12xf32>
    %c0_1 = arith.constant 0 : index
    %c0_2 = arith.constant 0 : index
    %1 = vector.load %arg2[%c0_1, %c0_2] : memref<12x16xf32, #tpu.memory_space<vmem>>, vector<12x16xf32>
    %cst = arith.constant dense<0.000000e+00> : vector<256x16xf32>
    %2 = tpu.matmul %0, %1, %cst {dimension_numbers = #tpu.dot_dimension_numbers<[1], [0], [0], [1], [0, 0, 1, 1], [], []>} : vector<256x12xf32>, vector<12x16xf32>, vector<256x16xf32> -> vector<256x16xf32>
    %c0_3 = arith.constant 0 : index
    %c0_4 = arith.constant 0 : index
    %3 = vector.load %arg3[%c0_3, %c0_4] : memref<1x16xf32, #tpu.memory_space<vmem>>, vector<1x16xf32>
    %4 = vector.broadcast %3 : vector<1x16xf32> to vector<256x16xf32>
    %5 = arith.addf %2, %4 : vector<256x16xf32>
    %c0_5 = arith.constant 0 : index
    %c0_6 = arith.constant 0 : index
    %6 = vector.load %arg4[%c0_5, %c0_6] : memref<256x16xf32, #tpu.memory_space<vmem>>, vector<256x16xf32>
    tpu.vector_store %arg4[%c0_5, %c0_6], %5 {strides = array<i32>} : memref<256x16xf32, #tpu.memory_space<vmem>>, vector<256x16xf32>,
    return
  }
  func.func @transform_0(%arg0: i32) -> (i32, i32) {
    %c0_i32 = arith.constant 0 : i32
    %c0_i32_0 = arith.constant 0 : i32
    return %arg0, %c0_i32 : i32, i32
  }
  func.func @transform_1(%arg0: i32) -> (i32, i32) {
    %c0_i32 = arith.constant 0 : i32
    %c0_i32_0 = arith.constant 0 : i32
    %c0_i32_1 = arith.constant 0 : i32
    return %c0_i32, %c0_i32_0 : i32, i32
  }
  func.func @transform_2(%arg0: i32) -> (i32, i32) {
    %c0_i32 = arith.constant 0 : i32
    %c0_i32_0 = arith.constant 0 : i32
    %c0_i32_1 = arith.constant 0 : i32
    return %c0_i32, %c0_i32_0 : i32, i32
  }
  func.func @transform_3(%arg0: i32) -> (i32, i32) {
    %c0_i32 = arith.constant 0 : i32
    %c0_i32_0 = arith.constant 0 : i32
    return %arg0, %c0_i32 : i32, i32
  }
}

</mosaic_0001>

<bundles_post_ra>
// kernel: tpu_custom_call.1
= control target key start
LH: loop header
LB: loop body
LE: loop exit
PB: predicated region body
PF: predicated region fallthrough
CT: control target
= control target key end

     0   :  { %s807_s12 = smov 0   ;;  %s1006_s0 = inlined_call_operand.vmem [shape: f32[512,12], index: 0, kind: input, shape index: {}]   ;;  %s1007_s1 = inlined_call_operand.vmem [shape: f32[12,16], index: 1, kind: input, shape index: {}]   ;;  %s1008_s2 = inlined_call_operand.vmem [shape: f32[1,16], index: 2, kind: input, shape index: {}]   ;;  %s1009_s3 = inlined_call_operand.vmem [shape: f32[512,16], index: 3, kind: output, shape index: {}]  }
   0x1 LB: > { %s630_s13 = sadd.s32 4294967295, %s784_s12   ;;  %p634_p0 = scmp.ge.s32.totalorder %s784_s12, 1  ;;  %s784_s12 = sphi %s807_s12, %s13_s12  }
   0x2   : > { %p138_p1 = scmp.lt.s32.totalorder %s784_s12, 3 }
   0x4   : > { %p139_p2 = pnand %p634_p0, %p138_p1 }
   0x5   : > { %v206_v0 = vld [vmem:[%s1007_s1] sm:$0xff] (!%p139_p2)  ;;  %v207_v1 = vld [vmem:[%s1007_s1 + $0x8] sm:$0xf] (!%p139_p2)  ;;  %vm312_vm0 = vcmask (!%p139_p2), 1043456   ;;  %s635_s18 = sshll.u32 (!%p139_p2), %s630_s13, 5  ;;  %vm786_vm1 = vmmov (!%p139_p2), 1  }
   0x6   : > { %142 = sbr.rel (%p139_p2) target bundleno = 263 (0x107), region = 32  ;;  %v761_v2 = vpack.c.bf16 (!%p139_p2), %v207_v1, %v206_v0  ;;  %vm762_vm2 = vmpackc.low (!%p139_p2), %vm312_vm0, %vm786_vm1  ;;  %p163_p3 = scmp.lt.s32.totalorder (!%p139_p2), %s635_s18, 63  ;;  %vm215_vm3 = vcmask (!%p139_p2), 97280   ;;  %v898_v35 = vld [vmem:[%s1008_s2] ss:$0 sm:$0xff] (!%p139_p2)  ;;  %vm541_vm4 = vcmask (!%p139_p2), 130048  }
   0x8   : > { %763 = vmatprep.subr.msk.bf16.mxu0 (!%p139_p2), %vm762_vm2, %v761_v2  ;;  %767 = vmatprep.subr.msk.bf16.mxu1 (!%p139_p2), %vm762_vm2, %v761_v2 }
   0x9   : > { %766 = vmatpush3.bf16.msk.msra.mxu0 (!%p139_p2), %vm762_vm2, %v761_v2  ;;  %768 = vmatpush3.bf16.msk.msra.mxu1 (!%p139_p2), %vm762_vm2, %v761_v2 }
   0xd   : > { %s1011_s18 = smov (!%p163_p3, %s635_s18), 63 }
   0xe   : > { %s636_s19 = sshll.u32 %s1011_s18, 3 }
   0xf   : > { %s829_s22 = scalar_lea.vmem %s1006_s0, %s636_s19  ;;  %s905_s27 = scalar_lea.vmem %s1009_s3, %s636_s19 }
  0x10   : > { %v174_v3 = vld [vmem:[%s829_s22] sm:$0xff]  ;;  %v175_v5 = vld [vmem:[%s829_s22 + $0x8] sm:$0xff]  ;;  %v176_v7 = vld [vmem:[%s829_s22 + $0x10] sm:$0xff] }
  0x11   : > { %v190_v4 = vld [vmem:[%s829_s22 + $0x80] sm:$0xff]  ;;  %713 = vmatprep.mubr.msk.f32.mxu0 %vm215_vm3, %v174_v3  ;;  %v191_v6 = vld [vmem:[%s829_s22 + $0x88] sm:$0xff]  ;;  %v192_v8 = vld [vmem:[%s829_s22 + $0x90] sm:$0xff] }
  0x12   : > { %737 = vmatprep.mubr.msk.f32.mxu1 %vm215_vm3, %v190_v4  ;;  %714 = vmatmul.mubr.msk.f32.vlgmr.msra.gmra.mrb[0].mxu0 %vm215_vm3, %v175_v5  ;;  %v177_v9 = vld [vmem:[%s829_s22 + $0x18] sm:$0xff]  ;;  %v178_v11 = vld [vmem:[%s829_s22 + $0x20] sm:$0xff]  ;;  %v179_v13 = vld [vmem:[%s829_s22 + $0x28] sm:$0xff] }
  0x13   : > { %738 = vmatmul.mubr.msk.f32.vlgmr.msra.gmra.mrb[0].mxu1 %vm215_vm3, %v191_v6  ;;  %716 = vmatprep.mubr.msk.f32.mxu0 %vm215_vm3, %v176_v7  ;;  %v193_v10 = vld [vmem:[%s829_s22 + $0x98] sm:$0xff]  ;;  %v194_v12 = vld [vmem:[%s829_s22 + $0xa0] sm:$0xff]  ;;  %v195_v14 = vld [vmem:[%s829_s22 + $0xa8] sm:$0xff] }
  0x14   : > { %740 = vmatprep.mubr.msk.f32.mxu1 %vm215_vm3, %v192_v8  ;;  %v180_v15 = vld [vmem:[%s829_s22 + $0x30] sm:$0xff]  ;;  %v181_v17 = vld [vmem:[%s829_s22 + $0x38] sm:$0xff]  ;;  %v182_v19 = vld [vmem:[%s829_s22 + $0x40] sm:$0xff] }
  0x15   : > { %v196_v16 = vld [vmem:[%s829_s22 + $0xb0] sm:$0xff]  ;;  %v197_v18 = vld [vmem:[%s829_s22 + $0xb8] sm:$0xff]  ;;  %v198_v20 = vld [vmem:[%s829_s22 + $0xc0] sm:$0xff] }
  0x16   : > { %717 = vmatmul.mubr.msk.f32.gmra.mrb[2].mxu0 %vm215_vm3, %v177_v9  ;;  %v183_v21 = vld [vmem:[%s829_s22 + $0x48] sm:$0xff]  ;;  %v184_v23 = vld [vmem:[%s829_s22 + $0x50] sm:$0xff]  ;;  %v185_v25 = vld [vmem:[%s829_s22 + $0x58] sm:$0xff] }
  0x17   : > { %741 = vmatmul.mubr.msk.f32.gmra.mrb[2].mxu1 %vm215_vm3, %v193_v10  ;;  %719 = vmatprep.mubr.msk.f32.mxu0 %vm215_vm3, %v178_v11  ;;  %v199_v22 = vld [vmem:[%s829_s22 + $0xc8] sm:$0xff]  ;;  %v200_v24 = vld [vmem:[%s829_s22 + $0xd0] sm:$0xff]  ;;  %v201_v26 = vld [vmem:[%s829_s22 + $0xd8] sm:$0xff] }
  0x18   : > { %743 = vmatprep.mubr.msk.f32.mxu1 %vm215_vm3, %v194_v12  ;;  %v186_v27 = vld [vmem:[%s829_s22 + $0x60] sm:$0xff]  ;;  %v187_v29 = vld [vmem:[%s829_s22 + $0x68] sm:$0xff]  ;;  %v188_v31 = vld [vmem:[%s829_s22 + $0x70] sm:$0xff] }
  0x19   : > { %v202_v28 = vld [vmem:[%s829_s22 + $0xe0] sm:$0xff]  ;;  %v203_v30 = vld [vmem:[%s829_s22 + $0xe8] sm:$0xff]  ;;  %v204_v32 = vld [vmem:[%s829_s22 + $0xf0] sm:$0xff] }
  0x1a   : > { %720 = vmatmul.mubr.msk.f32.gmra.mrb[4].mxu0 %vm215_vm3, %v179_v13  ;;  %v189_v33 = vld [vmem:[%s829_s22 + $0x78] sm:$0xff] }
  0x1b   : > { %744 = vmatmul.mubr.msk.f32.gmra.mrb[4].mxu1 %vm215_vm3, %v195_v14  ;;  %722 = vmatprep.mubr.msk.f32.mxu0 %vm215_vm3, %v180_v15  ;;  %v205_v34 = vld [vmem:[%s829_s22 + $0xf8] sm:$0xff] }
  0x1c   : > { %746 = vmatprep.mubr.msk.f32.mxu1 %vm215_vm3, %v196_v16 }
  0x1e   : > { %723 = vmatmul.mubr.msk.f32.gmra.mrb[6].mxu0 %vm215_vm3, %v181_v17 }
  0x1f   : > { %747 = vmatmul.mubr.msk.f32.gmra.mrb[6].mxu1 %vm215_vm3, %v197_v18  ;;  %725 = vmatprep.mubr.msk.f32.mxu0 %vm215_vm3, %v182_v19 }
  0x20   : > { %749 = vmatprep.mubr.msk.f32.mxu1 %vm215_vm3, %v198_v20 }
  0x22   : > { %726 = vmatmul.mubr.msk.f32.gmra.mrb[8].mxu0 %vm215_vm3, %v183_v21 }
  0x23   : > { %750 = vmatmul.mubr.msk.f32.gmra.mrb[8].mxu1 %vm215_vm3, %v199_v22  ;;  %728 = vmatprep.mubr.msk.f32.mxu0 %vm215_vm3, %v184_v23 }
  0x24   : > { %752 = vmatprep.mubr.msk.f32.mxu1 %vm215_vm3, %v200_v24 }
  0x26   : > { %729 = vmatmul.mubr.msk.f32.gmra.mrb[10].mxu0 %vm215_vm3, %v185_v25 }
  0x27   : > { %753 = vmatmul.mubr.msk.f32.gmra.mrb[10].mxu1 %vm215_vm3, %v201_v26  ;;  %731 = vmatprep.mubr.msk.f32.mxu0 %vm215_vm3, %v186_v27 }
  0x28   : > { %755 = vmatprep.mubr.msk.f32.mxu1 %vm215_vm3, %v202_v28 }
  0x2a   : > { %732 = vmatmul.mubr.msk.f32.gmra.mrb[12].mxu0 %vm215_vm3, %v187_v29 }
  0x2b   : > { %756 = vmatmul.mubr.msk.f32.gmra.mrb[12].mxu1 %vm215_vm3, %v203_v30  ;;  %734 = vmatprep.mubr.msk.f32.mxu0 %vm215_vm3, %v188_v31 }
  0x2c   : > { %758 = vmatprep.mubr.msk.f32.mxu1 %vm215_vm3, %v204_v32 }
  0x2e   : > { %735 = vmatmul.mubr.msk.f32.gmra.mrb[14].mxu0 %vm215_vm3, %v189_v33 }
  0x2f   : > { %759 = vmatmul.mubr.msk.f32.gmra.mrb[14].mxu1 %vm215_vm3, %v205_v34 }
  0xe5   : > { %v715_v36 = vpop.f32.mrb[0].mxu0 }
  0xe6   : > { %v739_v37 = vpop.f32.mrb[0].mxu1  ;;  %v388_v38 = vadd.f32 %v715_v36, %v898_v35  ;;  %v382_v40 = vpop.f32.mrb[1].mxu0 }
  0xe7   : > { %v468_v39 = vadd.f32 %v739_v37, %v898_v35  ;;  %v462_v41 = vpop.f32.mrb[1].mxu1  ;;  %v383_v42 = vadd.f32 %v898_v35, %v382_v40 }
  0xe8   : > { %v463_v43 = vadd.f32 %v898_v35, %v462_v41  ;;  %543 = vst.msk [vmem:[%s905_s27 + $0x8] sm:$0xff] %vm541_vm4, %v388_v38 }
  0xe9   : > { %559 = vst.msk [vmem:[%s905_s27 + $0x88] sm:$0xff] %vm541_vm4, %v468_v39  ;;  %542 = vst.msk [vmem:[%s905_s27] sm:$0xff] %vm541_vm4, %v383_v42  ;;  %v718_v44 = vpop.f32.mrb[2].mxu0 }
  0xea   : > { %558 = vst.msk [vmem:[%s905_s27 + $0x80] sm:$0xff] %vm541_vm4, %v463_v43  ;;  %v742_v45 = vpop.f32.mrb[2].mxu1  ;;  %v398_v46 = vadd.f32 %v718_v44, %v898_v35  ;;  %v392_v48 = vpop.f32.mrb[3].mxu0 }
  0xeb   : > { %v478_v47 = vadd.f32 %v742_v45, %v898_v35  ;;  %v472_v49 = vpop.f32.mrb[3].mxu1  ;;  %v393_v50 = vadd.f32 %v898_v35, %v392_v48 }
  0xec   : > { %v473_v51 = vadd.f32 %v898_v35, %v472_v49  ;;  %545 = vst.msk [vmem:[%s905_s27 + $0x18] sm:$0xff] %vm541_vm4, %v398_v46 }
  0xed   : > { %561 = vst.msk [vmem:[%s905_s27 + $0x98] sm:$0xff] %vm541_vm4, %v478_v47  ;;  %544 = vst.msk [vmem:[%s905_s27 + $0x10] sm:$0xff] %vm541_vm4, %v393_v50  ;;  %v721_v52 = vpop.f32.mrb[4].mxu0 }
  0xee   : > { %560 = vst.msk [vmem:[%s905_s27 + $0x90] sm:$0xff] %vm541_vm4, %v473_v51  ;;  %v745_v53 = vpop.f32.mrb[4].mxu1  ;;  %v408_v54 = vadd.f32 %v721_v52, %v898_v35  ;;  %v402_v56 = vpop.f32.mrb[5].mxu0 }
  0xef   : > { %v488_v55 = vadd.f32 %v745_v53, %v898_v35  ;;  %v482_v57 = vpop.f32.mrb[5].mxu1  ;;  %v403_v58 = vadd.f32 %v898_v35, %v402_v56 }
  0xf0   : > { %v483_v59 = vadd.f32 %v898_v35, %v482_v57  ;;  %547 = vst.msk [vmem:[%s905_s27 + $0x28] sm:$0xff] %vm541_vm4, %v408_v54 }
  0xf1   : > { %563 = vst.msk [vmem:[%s905_s27 + $0xa8] sm:$0xff] %vm541_vm4, %v488_v55  ;;  %546 = vst.msk [vmem:[%s905_s27 + $0x20] sm:$0xff] %vm541_vm4, %v403_v58  ;;  %v724_v60 = vpop.f32.mrb[6].mxu0 }
  0xf2   : > { %562 = vst.msk [vmem:[%s905_s27 + $0xa0] sm:$0xff] %vm541_vm4, %v483_v59  ;;  %v748_v61 = vpop.f32.mrb[6].mxu1  ;;  %v418_v62 = vadd.f32 %v724_v60, %v898_v35  ;;  %v412_v0 = vpop.f32.mrb[7].mxu0 }
  0xf3   : > { %v498_v63 = vadd.f32 %v748_v61, %v898_v35  ;;  %v492_v1 = vpop.f32.mrb[7].mxu1  ;;  %v413_v2 = vadd.f32 %v898_v35, %v412_v0 }
  0xf4   : > { %v493_v3 = vadd.f32 %v898_v35, %v492_v1  ;;  %549 = vst.msk [vmem:[%s905_s27 + $0x38] sm:$0xff] %vm541_vm4, %v418_v62 }
  0xf5   : > { %565 = vst.msk [vmem:[%s905_s27 + $0xb8] sm:$0xff] %vm541_vm4, %v498_v63  ;;  %548 = vst.msk [vmem:[%s905_s27 + $0x30] sm:$0xff] %vm541_vm4, %v413_v2  ;;  %v727_v4 = vpop.f32.mrb[8].mxu0 }
  0xf6   : > { %564 = vst.msk [vmem:[%s905_s27 + $0xb0] sm:$0xff] %vm541_vm4, %v493_v3  ;;  %v751_v5 = vpop.f32.mrb[8].mxu1  ;;  %v428_v6 = vadd.f32 %v727_v4, %v898_v35  ;;  %v422_v8 = vpop.f32.mrb[9].mxu0 }
  0xf7   : > { %v508_v7 = vadd.f32 %v751_v5, %v898_v35  ;;  %v502_v9 = vpop.f32.mrb[9].mxu1  ;;  %v423_v10 = vadd.f32 %v898_v35, %v422_v8 }
  0xf8   : > { %v503_v11 = vadd.f32 %v898_v35, %v502_v9  ;;  %551 = vst.msk [vmem:[%s905_s27 + $0x48] sm:$0xff] %vm541_vm4, %v428_v6 }
  0xf9   : > { %567 = vst.msk [vmem:[%s905_s27 + $0xc8] sm:$0xff] %vm541_vm4, %v508_v7  ;;  %550 = vst.msk [vmem:[%s905_s27 + $0x40] sm:$0xff] %vm541_vm4, %v423_v10  ;;  %v730_v12 = vpop.f32.mrb[10].mxu0 }
  0xfa   : > { %566 = vst.msk [vmem:[%s905_s27 + $0xc0] sm:$0xff] %vm541_vm4, %v503_v11  ;;  %v754_v13 = vpop.f32.mrb[10].mxu1  ;;  %v438_v14 = vadd.f32 %v730_v12, %v898_v35  ;;  %v432_v16 = vpop.f32.mrb[11].mxu0 }
  0xfb   : > { %v518_v15 = vadd.f32 %v754_v13, %v898_v35  ;;  %v512_v17 = vpop.f32.mrb[11].mxu1  ;;  %v433_v18 = vadd.f32 %v898_v35, %v432_v16 }
  0xfc   : > { %v513_v19 = vadd.f32 %v898_v35, %v512_v17  ;;  %553 = vst.msk [vmem:[%s905_s27 + $0x58] sm:$0xff] %vm541_vm4, %v438_v14 }
  0xfd   : > { %569 = vst.msk [vmem:[%s905_s27 + $0xd8] sm:$0xff] %vm541_vm4, %v518_v15  ;;  %552 = vst.msk [vmem:[%s905_s27 + $0x50] sm:$0xff] %vm541_vm4, %v433_v18  ;;  %v733_v20 = vpop.f32.mrb[12].mxu0 }
  0xfe   : > { %568 = vst.msk [vmem:[%s905_s27 + $0xd0] sm:$0xff] %vm541_vm4, %v513_v19  ;;  %v757_v21 = vpop.f32.mrb[12].mxu1  ;;  %v448_v22 = vadd.f32 %v733_v20, %v898_v35  ;;  %v442_v24 = vpop.f32.mrb[13].mxu0 }
  0xff   : > { %v528_v23 = vadd.f32 %v757_v21, %v898_v35  ;;  %v522_v25 = vpop.f32.mrb[13].mxu1  ;;  %v443_v26 = vadd.f32 %v898_v35, %v442_v24 }
 0x100   : > { %v523_v27 = vadd.f32 %v898_v35, %v522_v25  ;;  %555 = vst.msk [vmem:[%s905_s27 + $0x68] sm:$0xff] %vm541_vm4, %v448_v22 }
 0x101   : > { %571 = vst.msk [vmem:[%s905_s27 + $0xe8] sm:$0xff] %vm541_vm4, %v528_v23  ;;  %554 = vst.msk [vmem:[%s905_s27 + $0x60] sm:$0xff] %vm541_vm4, %v443_v26  ;;  %v736_v28 = vpop.f32.mrb[14].mxu0 }
 0x102   : > { %570 = vst.msk [vmem:[%s905_s27 + $0xe0] sm:$0xff] %vm541_vm4, %v523_v27  ;;  %v760_v29 = vpop.f32.mrb[14].mxu1  ;;  %v458_v30 = vadd.f32 %v736_v28, %v898_v35  ;;  %v452_v32 = vpop.f32.mrb[15].mxu0 }
 0x103   : > { %v538_v31 = vadd.f32 %v760_v29, %v898_v35  ;;  %v532_v33 = vpop.f32.mrb[15].mxu1  ;;  %v453_v34 = vadd.f32 %v898_v35, %v452_v32 }
 0x104   : > { %v533_v36 = vadd.f32 %v898_v35, %v532_v33  ;;  %557 = vst.msk [vmem:[%s905_s27 + $0x78] sm:$0xff] %vm541_vm4, %v458_v30 }
 0x105   : > { %573 = vst.msk [vmem:[%s905_s27 + $0xf8] sm:$0xff] %vm541_vm4, %v538_v31  ;;  %556 = vst.msk [vmem:[%s905_s27 + $0x70] sm:$0xff] %vm541_vm4, %v453_v34 }
 0x106   : > { %572 = vst.msk [vmem:[%s905_s27 + $0xf0] sm:$0xff] %vm541_vm4, %v533_v36 }
 0x107 PF: > { %s13_s12 = sadd.s32 1, %s784_s12  }
 0x108   : > { %p10_p4 = scmp.ge.s32.totalorder %s13_s12, 4  }
 0x10a   :  { %12 = sbr.rel (!%p10_p4) target bundleno = 1 (0x1), region = 62 }

</bundles_post_ra>
